<compile_context>
chip_gen: v6e
topology: v6e:2x2x1
jax: 0.10.0
libtpu: 0.0.40
codegen_flags: <defaults>
</compile_context>

<pallas_src>
import functools

import jax
import jax.numpy as jnp
from jax.experimental import pallas as pl
from jax.experimental.pallas import tpu as pltpu


def attention_kernel(h_ref, w_ref, o_ref, m_sc, l_sc, acc_sc):
    """One grid step: a (tb, ts, H) slab; online softmax over the sequence axis."""
    si = pl.program_id(1)

    @pl.when(si == 0)
    def _init():
        m_sc[...] = jnp.full_like(m_sc, -jnp.inf)
        l_sc[...] = jnp.zeros_like(l_sc)
        acc_sc[...] = jnp.zeros_like(acc_sc)

    h = h_ref[...].astype(jnp.float32)            # (tb, ts, H) -- cast once, reused
    w = w_ref[...].astype(jnp.float32)            # (1, H) lane-dense weight row

    # attention scores: lane-dense broadcast multiply + lane reduce (VPU + XLU);
    # avoids the lane-sparse (S,H)@(H,1) N=1 MXU matmul.
    scores = jnp.sum(h * w[:, None, :], axis=-1)                      # (tb, ts)

    # online softmax over the sequence axis
    m_prev = m_sc[...]                                                # (tb, 1)
    m_new = jnp.maximum(m_prev, jnp.max(scores, axis=-1, keepdims=True))
    alpha = jnp.exp(m_prev - m_new)                                   # (tb, 1)
    p = jnp.exp(scores - m_new)                                       # (tb, ts)

    l_sc[...] = alpha * l_sc[...] + jnp.sum(p, axis=-1, keepdims=True)

    # weighted partial sum on the MXU (batched matvec, K=ts, N=H); the MXU is
    # otherwise idle, and this avoids a full (tb, ts, H) elementwise temporary.
    pv = jnp.einsum("bqs,bsh->bqh", p[:, None, :], h,
                    preferred_element_type=jnp.float32)               # (tb, 1, H)
    acc_sc[...] = alpha * acc_sc[...] + pv[:, 0, :]
    m_sc[...] = m_new

    @pl.when(si == pl.num_programs(1) - 1)
    def _finalize():
        l = l_sc[...]
        inv_l = pl.reciprocal(l, approx=True)          # EUP slot (free in this kernel)
        inv_l = inv_l * (2.0 - l * inv_l)              # one Newton step -> ~f32 accuracy
        o_ref[...] = (acc_sc[...] * inv_l).astype(o_ref.dtype)


def _choose_tiles(B, S, H, itemsize, batch_block, seq_block):
    # One hidden-state block is double-buffered by the pipeline; a 12 MiB/block
    # budget keeps ~24 MiB in flight -- comfortably under v7x's 64 MiB physical
    # VMEM while large enough to sit near the HBM roofline on v5e/v6e.
    block_budget = 12 * 1024 * 1024

    if batch_block is not None:
        tb = min(batch_block, B)
        if B > tb:
            tb = max(8, (tb // 8) * 8)     # sublane-dense (tb, H) output blocks
    elif B <= 8:
        tb = B                             # full-dim block satisfies the (8,128) rule
    else:
        tb = 8
        while (tb * 2 <= 64 and tb * 2 <= B
               and tb * 2 * S * H * itemsize <= block_budget):
            tb *= 2

    if (seq_block is not None and S % seq_block == 0
            and (seq_block % 8 == 0 or seq_block == S)):
        ts = seq_block
    elif tb * S * H * itemsize <= block_budget:
        ts = S
    else:
        divisors = [d for d in range(8, S, 8)
                    if S % d == 0 and tb * d * H * itemsize <= block_budget]
        # TODO(synk): an S with no suitable multiple-of-8 divisor would need a
        # masked online-softmax tail; fall back to a full-S block instead.
        ts = max(divisors) if divisors else S
    return tb, ts


@functools.partial(jax.jit, static_argnames=("batch_block", "seq_block"))
def attention_layer(hidden_states, attention_weights, *,
                    batch_block=None, seq_block=None):
    """hidden_states: (B, S, H); attention_weights: (H, 1). Returns (B, H)."""
    B, S, H = hidden_states.shape
    dtype = hidden_states.dtype
    itemsize = jnp.dtype(dtype).itemsize

    tb, ts = _choose_tiles(B, S, H, itemsize, batch_block, seq_block)

    # lane-dense weight: (H, 1) -> (1, H); avoids an H x 128-lane padded VMEM buffer.
    w_row = attention_weights.reshape(1, H)

    # Pad the batch so the grid divides evenly. Padded (all-zero) rows give a
    # uniform softmax and a zero weighted sum; they are sliced off below.
    b_pad = ((B + tb - 1) // tb) * tb
    h_in = hidden_states
    if b_pad != B:
        h_in = jnp.pad(hidden_states, ((0, b_pad - B), (0, 0), (0, 0)))

    grid = (b_pad // tb, S // ts)

    out = pl.pallas_call(
        attention_kernel,
        out_shape=jax.ShapeDtypeStruct((b_pad, H), dtype),
        grid_spec=pltpu.PrefetchScalarGridSpec(
            num_scalar_prefetch=0,
            grid=grid,
            in_specs=[
                pl.BlockSpec((tb, ts, H), lambda bi, si: (bi, si, 0)),
                pl.BlockSpec((1, H), lambda bi, si: (0, 0)),
            ],
            out_specs=pl.BlockSpec((tb, H), lambda bi, si: (bi, 0)),
            scratch_shapes=[
                pltpu.VMEM((tb, 1), jnp.float32),   # running max  m
                pltpu.VMEM((tb, 1), jnp.float32),   # running sum  l
                pltpu.VMEM((tb, H), jnp.float32),   # running weighted sum
            ],
        ),
        compiler_params=pltpu.CompilerParams(
            dimension_semantics=("parallel", "arbitrary"),
            vmem_limit_bytes=48 * 1024 * 1024,
        ),
    )(h_in, w_row)
    return out[:B]


def attention_layer_ref(hidden_states, attention_weights):
    """Pure-JAX reference mirroring the PyTorch forward."""
    scores = jnp.matmul(hidden_states, attention_weights,
                        precision=jax.lax.Precision.HIGHEST).squeeze(-1)  # (B, S)
    weights = jax.nn.softmax(scores, axis=1)                              # (B, S)
    return jnp.sum(hidden_states * weights[..., None], axis=1)            # (B, H)


if __name__ == "__main__":
    key = jax.random.PRNGKey(0)
    k1, k2, k3 = jax.random.split(key, 3)

    # Small shapes implied by the module: (batch, seq_len, hidden_size)
    B, S, H = 2, 8, 32
    hidden_states = jax.random.normal(k1, (B, S, H), dtype=jnp.float32)
    attention_weights = jax.random.normal(k2, (H, 1), dtype=jnp.float32)

    out = jax.block_until_ready(attention_layer(hidden_states, attention_weights))
    ref = attention_layer_ref(hidden_states, attention_weights)
    assert out.shape == (B, H)
    assert jnp.allclose(out, ref, atol=1e-5, rtol=1e-5), "mismatch vs reference (small)"

    # Exercise batch tiling + padding and the multi-step online-softmax path.
    B2, S2, H2 = 20, 32, 128
    h2 = jax.random.normal(k3, (B2, S2, H2), dtype=jnp.float32)
    w2 = jax.random.normal(k2, (H2, 1), dtype=jnp.float32)
    out2 = jax.block_until_ready(attention_layer(h2, w2, batch_block=8, seq_block=8))
    ref2 = attention_layer_ref(h2, w2)
    assert out2.shape == (B2, H2)
    # Slightly looser tolerance: online-softmax accumulation order / MXU f32
    # pass decomposition differ from the exact reference.
    assert jnp.allclose(out2, ref2, atol=2e-3, rtol=2e-3), "mismatch vs reference (tiled)"

    print("KERNEL_OK")
</pallas_src>

<mosaic_0001>
module attributes {stable_mosaic.version = 11 : i64} {
  func.func @attention_kernel(%arg0: i32, %arg1: i32, %arg2: memref<2x8x32xf32, #tpu.memory_space<vmem>>, %arg3: memref<1x32xf32, #tpu.memory_space<vmem>>, %arg4: memref<2x32xf32, #tpu.memory_space<vmem>>, %arg5: memref<2x1xf32, #tpu.memory_space<vmem>>, %arg6: memref<2x1xf32, #tpu.memory_space<vmem>>, %arg7: memref<2x32xf32, #tpu.memory_space<vmem>>) attributes {dimension_semantics = [#tpu.dimension_semantics<parallel>, #tpu.dimension_semantics<arbitrary>], iteration_bounds = array<i64: 1, 1>, scalar_prefetch = 0 : i64, scratch_operands = 3 : i64, tpu.core_type = #tpu.core_type<tc>, window_params = [{transform_indices = @transform_0, window_bounds = array<i64: 2, 8, 32>}, {pipeline_mode = #tpu.pipeline_mode<synchronous>, transform_indices = @transform_1, window_bounds = array<i64: 1, 32>}, {transform_indices = @transform_2, window_bounds = array<i64: 2, 32>}]} {
    %c0_i32 = arith.constant 0 : i32
    %0 = arith.cmpi eq, %arg1, %c0_i32 : i32
    %1 = arith.extui %0 : i1 to i32
    %c0_i32_0 = arith.constant 0 : i32
    %2 = arith.cmpi ne, %1, %c0_i32_0 : i32
    scf.if %2 {
      %cst_22 = arith.constant 0xFF800000 : f32
      %36 = vector.broadcast %cst_22 : f32 to vector<2x1xf32>
      %c0_23 = arith.constant 0 : index
      %c0_24 = arith.constant 0 : index
      %37 = vector.load %arg5[%c0_23, %c0_24] : memref<2x1xf32, #tpu.memory_space<vmem>>, vector<2x1xf32>
      tpu.vector_store %arg5[%c0_23, %c0_24], %36 {strides = array<i32>} : memref<2x1xf32, #tpu.memory_space<vmem>>, vector<2x1xf32>,
      %cst_25 = arith.constant 0.000000e+00 : f32
      %38 = vector.broadcast %cst_25 : f32 to vector<2x1xf32>
      %c0_26 = arith.constant 0 : index
      %c0_27 = arith.constant 0 : index
      %39 = vector.load %arg6[%c0_26, %c0_27] : memref<2x1xf32, #tpu.memory_space<vmem>>, vector<2x1xf32>
      tpu.vector_store %arg6[%c0_26, %c0_27], %38 {strides = array<i32>} : memref<2x1xf32, #tpu.memory_space<vmem>>, vector<2x1xf32>,
      %cst_28 = arith.constant 0.000000e+00 : f32
      %40 = vector.broadcast %cst_28 : f32 to vector<2x32xf32>
      %c0_29 = arith.constant 0 : index
      %c0_30 = arith.constant 0 : index
      %41 = vector.load %arg7[%c0_29, %c0_30] : memref<2x32xf32, #tpu.memory_space<vmem>>, vector<2x32xf32>
      tpu.vector_store %arg7[%c0_29, %c0_30], %40 {strides = array<i32>} : memref<2x32xf32, #tpu.memory_space<vmem>>, vector<2x32xf32>,
    } else {
    }
    %c0 = arith.constant 0 : index
    %c0_1 = arith.constant 0 : index
    %c0_2 = arith.constant 0 : index
    %3 = vector.load %arg2[%c0, %c0_1, %c0_2] : memref<2x8x32xf32, #tpu.memory_space<vmem>>, vector<2x8x32xf32>
    %c0_3 = arith.constant 0 : index
    %c0_4 = arith.constant 0 : index
    %4 = vector.load %arg3[%c0_3, %c0_4] : memref<1x32xf32, #tpu.memory_space<vmem>>, vector<1x32xf32>
    %5 = vector.shape_cast %4 : vector<1x32xf32> to vector<1x1x32xf32>
    %6 = vector.broadcast %5 : vector<1x1x32xf32> to vector<2x8x32xf32>
    %7 = arith.mulf %3, %6 : vector<2x8x32xf32>
    %cst = arith.constant dense<0.000000e+00> : vector<2x8xf32>
    %8 = vector.multi_reduction <add>, %7, %cst [2] : vector<2x8x32xf32> to vector<2x8xf32>
    %c0_5 = arith.constant 0 : index
    %c0_6 = arith.constant 0 : index
    %9 = vector.load %arg5[%c0_5, %c0_6] : memref<2x1xf32, #tpu.memory_space<vmem>>, vector<2x1xf32>
    %cst_7 = arith.constant dense<0xFF800000> : vector<2xf32>
    %10 = vector.multi_reduction <maximumf>, %8, %cst_7 [1] : vector<2x8xf32> to vector<2xf32>
    %11 = vector.shape_cast %10 : vector<2xf32> to vector<2x1xf32>
    %12 = arith.maximumf %9, %11 : vector<2x1xf32>
    %13 = arith.subf %9, %12 : vector<2x1xf32>
    %14 = math.exp %13 : vector<2x1xf32>
    %15 = vector.broadcast %12 : vector<2x1xf32> to vector<2x8xf32>
    %16 = arith.subf %8, %15 : vector<2x8xf32>
    %17 = math.exp %16 : vector<2x8xf32>
    %c0_8 = arith.constant 0 : index
    %c0_9 = arith.constant 0 : index
    %18 = vector.load %arg6[%c0_8, %c0_9] : memref<2x1xf32, #tpu.memory_space<vmem>>, vector<2x1xf32>
    %19 = arith.mulf %14, %18 : vector<2x1xf32>
    %cst_10 = arith.constant dense<0.000000e+00> : vector<2xf32>
    %20 = vector.multi_reduction <add>, %17, %cst_10 [1] : vector<2x8xf32> to vector<2xf32>
    %21 = vector.shape_cast %20 : vector<2xf32> to vector<2x1xf32>
    %22 = arith.addf %19, %21 : vector<2x1xf32>
    %c0_11 = arith.constant 0 : index
    %c0_12 = arith.constant 0 : index
    %23 = vector.load %arg6[%c0_11, %c0_12] : memref<2x1xf32, #tpu.memory_space<vmem>>, vector<2x1xf32>
    tpu.vector_store %arg6[%c0_11, %c0_12], %22 {strides = array<i32>} : memref<2x1xf32, #tpu.memory_space<vmem>>, vector<2x1xf32>,
    %24 = vector.shape_cast %17 : vector<2x8xf32> to vector<2x1x8xf32>
    "tpu.trace_start"() <{level = 10 : i32, message = "bqs,bsh->bqh"}> : () -> ()
    %cst_13 = arith.constant dense<0.000000e+00> : vector<2x1x32xf32>
    %25 = tpu.matmul %24, %3, %cst_13 {dimension_numbers = #tpu.dot_dimension_numbers<[2], [1], [1], [2], [0, 0, 0, 1, 1, 2], [0], [0]>} : vector<2x1x8xf32>, vector<2x8x32xf32>, vector<2x1x32xf32> -> vector<2x1x32xf32>
    "tpu.trace_stop"() : () -> ()
    %c0_14 = arith.constant 0 : index
    %c0_15 = arith.constant 0 : index
    %26 = vector.load %arg7[%c0_14, %c0_15] : memref<2x32xf32, #tpu.memory_space<vmem>>, vector<2x32xf32>
    %27 = vector.broadcast %14 : vector<2x1xf32> to vector<2x32xf32>
    %28 = arith.mulf %27, %26 : vector<2x32xf32>
    %29 = vector.shape_cast %25 : vector<2x1x32xf32> to vector<2x32xf32>
    %30 = arith.addf %28, %29 : vector<2x32xf32>
    %c0_16 = arith.constant 0 : index
    %c0_17 = arith.constant 0 : index
    %31 = vector.load %arg7[%c0_16, %c0_17] : memref<2x32xf32, #tpu.memory_space<vmem>>, vector<2x32xf32>
    tpu.vector_store %arg7[%c0_16, %c0_17], %30 {strides = array<i32>} : memref<2x32xf32, #tpu.memory_space<vmem>>, vector<2x32xf32>,
    %c0_18 = arith.constant 0 : index
    %c0_19 = arith.constant 0 : index
    %32 = vector.load %arg5[%c0_18, %c0_19] : memref<2x1xf32, #tpu.memory_space<vmem>>, vector<2x1xf32>
    tpu.vector_store %arg5[%c0_18, %c0_19], %12 {strides = array<i32>} : memref<2x1xf32, #tpu.memory_space<vmem>>, vector<2x1xf32>,
    %c0_i32_20 = arith.constant 0 : i32
    %33 = arith.cmpi eq, %arg1, %c0_i32_20 : i32
    %34 = arith.extui %33 : i1 to i32
    %c0_i32_21 = arith.constant 0 : i32
    %35 = arith.cmpi ne, %34, %c0_i32_21 : i32
    scf.if %35 {
      %c0_22 = arith.constant 0 : index
      %c0_23 = arith.constant 0 : index
      %36 = vector.load %arg6[%c0_22, %c0_23] : memref<2x1xf32, #tpu.memory_space<vmem>>, vector<2x1xf32>
      %37 = tpu.reciprocal %36 {approx = true} : vector<2x1xf32> -> vector<2x1xf32>
      %38 = arith.mulf %36, %37 : vector<2x1xf32>
      %cst_24 = arith.constant 2.000000e+00 : f32
      %39 = vector.broadcast %cst_24 : f32 to vector<2x1xf32>
      %40 = arith.subf %39, %38 : vector<2x1xf32>
      %41 = arith.mulf %37, %40 : vector<2x1xf32>
      %c0_25 = arith.constant 0 : index
      %c0_26 = arith.constant 0 : index
      %42 = vector.load %arg7[%c0_25, %c0_26] : memref<2x32xf32, #tpu.memory_space<vmem>>, vector<2x32xf32>
      %43 = vector.broadcast %41 : vector<2x1xf32> to vector<2x32xf32>
      %44 = arith.mulf %42, %43 : vector<2x32xf32>
      %c0_27 = arith.constant 0 : index
      %c0_28 = arith.constant 0 : index
      %45 = vector.load %arg4[%c0_27, %c0_28] : memref<2x32xf32, #tpu.memory_space<vmem>>, vector<2x32xf32>
      tpu.vector_store %arg4[%c0_27, %c0_28], %44 {strides = array<i32>} : memref<2x32xf32, #tpu.memory_space<vmem>>, vector<2x32xf32>,
    } else {
    }
    return
  }
  func.func @transform_0(%arg0: i32, %arg1: i32) -> (i32, i32, i32) {
    %c0_i32 = arith.constant 0 : i32
    %c0_i32_0 = arith.constant 0 : i32
    return %arg0, %arg1, %c0_i32 : i32, i32, i32
  }
  func.func @transform_1(%arg0: i32, %arg1: i32) -> (i32, i32) {
    %c0_i32 = arith.constant 0 : i32
    %c0_i32_0 = arith.constant 0 : i32
    %c0_i32_1 = arith.constant 0 : i32
    return %c0_i32, %c0_i32_0 : i32, i32
  }
  func.func @transform_2(%arg0: i32, %arg1: i32) -> (i32, i32) {
    %c0_i32 = arith.constant 0 : i32
    %c0_i32_0 = arith.constant 0 : i32
    return %arg0, %c0_i32 : i32, i32
  }
}

</mosaic_0001>

<bundles_post_ra>
// kernel: attention_layer.1
= control target key start
LH: loop header
LB: loop body
LE: loop exit
PB: predicated region body
PF: predicated region fallthrough
CT: control target
= control target key end

     0   :  { %7 = vsyncpa [#allocation6], 0  ;;  %s438_s0 = inlined_call_operand.hbm [shape: f32[2,8,32], index: 0, kind: input, shape index: {}]   ;;  %s439_s1 = inlined_call_operand.vmem [shape: f32[1,32], index: 1, kind: input, shape index: {}]   ;;  %s440_s2 = inlined_call_operand.hbm [shape: f32[2,32], index: 2, kind: output, shape index: {}]  }
   0x1   :  { %8 = vsyncpa [#allocation7], 0  ;;  %s394_s9 = smov [#allocation5]  }
   0x2   :  { %s14_s10 = sshll.u32 %s394_s9, 4  ;;  %s15_s10 = int_to_ptr.vmem [resolvable:$true] %s14_s10 }
   0x3   :  { %s358_s11 = scalar_lea.vmem %s15_s10, 256  ;;  %p363_p1 = scmp.lt.s32.totalorder %s15_s10, %s15_s10 }
   0x4   :  { %p359_p0 = scmp.ne.s32.totalorder %s15_s10, %s358_s11  ;;  %p364_p2 = scmp.lt.s32.totalorder %s358_s11, %s358_s11 }
   0x6   :  { %p365_p3 = por %p364_p2, %p363_p1 }
   0x8   :  { %p366_p4 = pnand %p365_p3, %p359_p0 }
   0xa   :  { %369 = shalt.err (!%p366_p4)
}
   0xb   :  { %s395_s12 = smov 128   ;;  %s396_s13 = smov 8  }
   0xc   :  { %20 = dma.hbm_to_vmem [thread:$0]  %s438_s0, 256, %s15_s10, [#allocation6], %s395_s12, %s395_s12, %s396_s13  }
   0xd   :  { %390 = dma.done.wait [#allocation6], 256  }
   0xe   :  { %391 = vsyncadd [#allocation6], 4294967040  ;;  %v35_v0 = vld [vmem:[#allocation5] sm:$0xff]  ;;  %v315_v1 = vld [vmem:[%s439_s1] ss:$0 sm:$0xff]  ;;  %vm46_vm0 = vcmask 261120   ;;  %v56_v8 = vlaneseq }
   0xf   :  { %v36_v2 = vld [vmem:[#allocation5 + $0x8] sm:$0xff]  ;;  %v44_v3 = vmul.f32 %v315_v1, %v35_v0  ;;  %vm30_vm1 = vcmask 1024   ;;  %v397_v7 = vmov -inf   ;;  %vm66_vm2 = vcmask 1041409   ;;  %s401_s0 = smov [#allocation8]  }
  0x10   :  { %v45_v4 = vmul.f32 %v315_v1, %v36_v2  ;;  %31 = vst.msk [vmem:[#allocation2] sm:$0x3] %vm30_vm1, %v397_v7  ;;  %v57_v9 = vand.u32 127, %v56_v8  ;;  %v59_v10 = vshrl.u32 %v56_v8, 7  ;;  %vm69_vm3 = vcmask 58368   ;;  %s306_s1 = sshll.u32 %s401_s0, 4  ;;  %s307_s1 = int_to_ptr.vmem [resolvable:$true] %s306_s1 }
  0x11   :  { %v47_v5 = vsel %vm46_vm0, %v44_v3, 0.0  ;;  %v398_v18 = vmov 0   ;;  %v399_v19 = vmov 0.0   ;;  %vm33_vm4 = vcmask 254976   ;;  %s370_s18 = scalar_lea.vmem %s307_s1, 32  ;;  %p375_p6 = scmp.lt.s32.totalorder %s307_s1, %s307_s1 }
  0x12   :  { %48 = vadd.xlane.f32.xlu0 %v47_v5  ;;  %v50_v6 = vsel %vm46_vm0, %v45_v4, 0.0  ;;  %v60_v12 = vsub.s32 %v57_v9, %v59_v10  ;;  %340 = vset.pattern.permute.xlu1 %v398_v18  ;;  %32 = vst.msk [vmem:[#allocation3] sm:$0x3] %vm30_vm1, %v399_v19  ;;  %v83_v24 = vsub.s32 0, %v59_v10  ;;  %v87_v25 = vsub.s32 1, %v59_v10  ;;  %p371_p5 = scmp.ne.s32.totalorder %s307_s1, %s370_s18  ;;  %p376_p7 = scmp.lt.s32.totalorder %s370_s18, %s370_s18 }
  0x13   :  { %341 = vset.pattern.permute.xlu0 %v398_v18  ;;  %322 = vmatprep.subr.mxu0 %v399_v19  ;;  %34 = vst.msk [vmem:[#allocation4] sm:$0x3] %vm33_vm4, %v399_v19  ;;  %vm400_vm5 = vmmov 0   ;;  %vm123_vm6 = vcmask 64512  }
  0x14   :  { %327 = vmatprep.subr.mxu1 %v399_v19  ;;  %323 = vmatpush3.msra.mxu0 %v35_v0  ;;  %p377_p8 = por %p376_p7, %p375_p6 }
  0x15   :  { %328 = vmatpush3.msra.mxu1 %v36_v2  ;;  %324 = vmatprep.mubr.msk.f32.mxu0 %vm400_vm5, %v399_v19 }
  0x16   :  { %51 = vadd.xlane.f32.xlu0 %v50_v6  ;;  %329 = vmatprep.mubr.msk.f32.mxu1 %vm400_vm5, %v399_v19  ;;  %p378_p9 = pnand %p377_p8, %p371_p5 }
  0x17   :  { %v53_v20 = vld [vmem:[#allocation2] sm:$0x3] }
  0x19   :  { %v97_v43 = vld [vmem:[#allocation3] sm:$0x3] }
  0x1a   :  { %v268_v52 = vld [vmem:[#allocation4] sm:$0x3] }
  0x9b   :  { %v49_v11 = vpop.xlane.xlu0 %48 }
  0x9c   :  { %v61_v14 = vrot.slane %v49_v11, %v60_v12 }
  0x9f   :  { %v52_v13 = vpop.xlane.xlu0 %51 }
  0xa0   :  { %v65_v15 = vrot.slane %v52_v13, %v60_v12 }
  0xa2   :  { %v67_v16 = vsel %vm66_vm2, %v65_v15, %v61_v14 }
  0xa3   :  { %v70_v17 = vsel %vm69_vm3, %v67_v16, -inf }
  0xa4   :  { %71 = vmax.xlane.f32.xlu1 %v70_v17 }
 0x12d   :  { %v72_v21 = vpop.xlane.xlu1 %71 }
 0x12e   :  { %v73_v22 = vmax.f32 %v53_v20, %v72_v21 }
 0x130   :  { %v74_v23 = vsub.f32 %v53_v20, %v73_v22  ;;  %283 = vst.msk [vmem:[#allocation2] sm:$0x3] %vm30_vm1, %v73_v22  ;;  %79 = vperm.xlu1 %340, %v73_v22  }
 0x132   :  { %v75_v33 = vmul.f32 1.442695, %v74_v23 }
 0x1ab   :  { %v80_v26 = vpop.permute.xlu1 %79 }
 0x1ac   :  { %v84_v27 = vrot.slane %v80_v26, %v83_v24  ;;  %v88_v28 = vrot.slane %v80_v26, %v87_v25 }
 0x1ae   :  { %v91_v29 = vsub.f32 %v49_v11, %v84_v27  ;;  %v92_v30 = vsub.f32 %v52_v13, %v88_v28 }
 0x1b0   :  { %v93_v31 = vmul.f32 1.442695, %v91_v29  ;;  %v95_v32 = vmul.f32 1.442695, %v92_v30 }
 0x1b2   :  { %342 = vpow2.f32 %v93_v31 }
 0x1b3   :  { %344 = vpow2.f32 %v95_v32 }
 0x1b4   :  { %346 = vpow2.f32 %v75_v33 }
 0x1bf   :  { %v343_v34 = vpop.eup %342 }
 0x1c0   :  { %v345_v35 = vpop.eup %344  ;;  %102 = vperm.xlu1 %340, %v343_v34  }
 0x1c1   :  { %105 = vperm.xlu0 %341, %v345_v35   ;;  %v347_v36 = vpop.eup %346 }
 0x1c2   :  { %v98_v44 = vmul.f32 %v347_v36, %v97_v43 }
 0x1c5   :  { %271 = vperm.xlu0 %341, %v347_v36  }
 0x23b   :  { %v103_v37 = vpop.permute.xlu1 %102 }
 0x23c   :  { %v106_v38 = vpop.permute.xlu0 %105  ;;  %v110_v39 = vrot.slane %v103_v37, %v60_v12 }
 0x23d   :  { %v114_v40 = vrot.slane %v106_v38, %v60_v12 }
 0x23e   :  { %325 = vmatmul.mubr.msk.f32.vlgmr.msra.gmra.mxu0 %vm123_vm6, %v110_v39 }
 0x23f   :  { %330 = vmatmul.mubr.msk.f32.vlgmr.msra.gmra.mxu1 %vm123_vm6, %v114_v40  ;;  %v115_v41 = vsel %vm66_vm2, %v114_v40, %v110_v39 }
 0x240   :  { %v117_v42 = vsel %vm69_vm3, %v115_v41, 0.0  ;;  %v272_v53 = vpop.permute.xlu0 %271 }
 0x241   :  { %118 = vadd.xlane.f32.xlu1 %v117_v42  ;;  %v274_v58 = vmul.f32 %v272_v53, %v268_v52 }
 0x2ca   :  { %v119_v45 = vpop.xlane.xlu1 %118 }
 0x2cb   :  { %v120_v46 = vadd.f32 %v119_v45, %v98_v44 }
 0x2cd   :  { %122 = vst.msk [vmem:[#allocation3] sm:$0x3] %vm30_vm1, %v120_v46 }
 0x2d4   :  { %v287_v47 = vld [vmem:[#allocation3] sm:$0x3] }
 0x2d5   :  { %348 = vrcp.f32 %v287_v47 }
 0x2e2   :  { %v349_v48 = vpop.eup %348 }
 0x2e3   :  { %v289_v49 = vmul.f32 %v349_v48, %v287_v47 }
 0x2e5   :  { %v290_v50 = vsub.f32 2.0, %v289_v49 }
 0x2e7   :  { %v291_v51 = vmul.f32 %v349_v48, %v290_v50 }
 0x2e9   :  { %295 = vperm.xlu0 %341, %v291_v51  }
 0x2fe   :  { %v192_v54 = vpop.f32.mrf.mxu0 }
 0x2ff   :  { %v264_v55 = vpop.f32.mrf.mxu1 }
 0x300   :  { %v277_v56 = vrot.slane %v264_v55, 7  ;;  %v326_v57 = vpop.f32.mrf.mxu0 }
 0x301   :  { %v331_v59 = vpop.f32.mrf.mxu1 }
 0x302   :  { %v278_v60 = vsel %vm66_vm2, %v277_v56, %v192_v54 }
 0x303   :  { %v280_v61 = vadd.f32 %v278_v60, %v274_v58 }
 0x305   :  { %282 = vst.msk [vmem:[#allocation4] sm:$0x3] %vm33_vm4, %v280_v61 }
 0x30c   :  { %v292_v62 = vld [vmem:[#allocation4] sm:$0x3] }
 0x364   :  { %v296_v63 = vpop.permute.xlu0 %295 }
 0x365   :  { %v298_v0 = vmul.f32 %v296_v63, %v292_v62 }
 0x367   :  { %299 = vst.msk [vmem:[#allocation8] sm:$0x3] %vm33_vm4, %v298_v0 }
 0x368   :  { %381 = shalt.err (!%p378_p9)
}
 0x369   :  { %309 = dma.vmem_to_hbm [thread:$0]  %s307_s1, 32, %s440_s2, [#allocation7]  }
 0x36a   :  { %392 = dma.done.wait [#allocation7], 32  }
 0x36b   :  { %393 = vsyncadd [#allocation7], 4294967264 }
 0x36c   :  { %313 = vsyncpa [#allocation6], 1 }
 0x36d   :  { %314 = vsyncpa [#allocation7], 1 }

</bundles_post_ra>
